<compile_context>
chip_gen: v7x
topology: tpu7x:2x2x1
jax: 0.10.0
libtpu: 0.0.40
codegen_flags: <defaults>
</compile_context>

<pallas_src>
import functools

import jax
import jax.numpy as jnp
from jax.experimental import pallas as pl
from jax.experimental.pallas import tpu as pltpu


def _round_up(x, m):
    return ((x + m - 1) // m) * m


def _batch_tile(batch, n, fin, fpad, itemsize, budget_bytes=8 << 20):
    """Largest divisor TB of `batch` whose double-buffered X/out blocks fit the budget."""
    best = 1
    for tb in range(1, batch + 1):
        if batch % tb:
            continue
        if 2 * tb * n * (fin + fpad) * itemsize <= budget_bytes:
            best = tb
    return best


def lam_gconv_kernel(l_ref, x_ref, w_ref, b_ref, o_ref, *, tb, aggregate_first):
    # l_ref : (N, N)        normalized Laplacian (precomputed once, shared across batch)
    # x_ref : (TB, N, Fin)  TB batch elements of features
    # w_ref : (Fin, Fp)     linear weight W.T, zero-padded to Fp = round_up(Fout, 128)
    # b_ref : (1, Fp)       bias (f32, zero-padded)
    # o_ref : (TB, N, Fp)   lane-dense output block
    n = l_ref.shape[0]
    fp = w_ref.shape[1]
    L = l_ref[...]                                   # input dtype (bf16-friendly)
    W = w_ref[...]
    # Hoist the bias broadcast out of the per-batch loop (JAX does not CSE it);
    # epilogue math stays in f32 (safe on v5e: no bf16 VALU path needed).
    bias = jnp.broadcast_to(b_ref[...], (n, fp))     # (N, Fp) f32

    if aggregate_first:
        # Fin <= Fout: aggregate on the narrow feature dim first (fewer MXU MACs).
        for t in range(tb):
            y = jnp.dot(L, x_ref[t], preferred_element_type=jnp.float32)    # (N, Fin)
            z = jnp.dot(y.astype(W.dtype), W,
                        preferred_element_type=jnp.float32)                 # (N, Fp)
            o_ref[t] = jnp.maximum(z + bias, 0.0).astype(o_ref.dtype)
    else:
        # Fin > Fout: apply the linear first as ONE batched matmul over all TB*N
        # rows, then aggregate per batch element with the shared L.
        fin = x_ref.shape[2]
        x_all = x_ref[...].reshape(tb * n, fin)                             # (TB*N, Fin)
        z0 = jnp.dot(x_all, W, preferred_element_type=jnp.float32)          # (TB*N, Fp)
        z0 = z0.astype(L.dtype)
        for t in range(tb):
            z = jnp.dot(L, z0[t * n:(t + 1) * n, :],
                        preferred_element_type=jnp.float32)                 # (N, Fp)
            o_ref[t] = jnp.maximum(z + bias, 0.0).astype(o_ref.dtype)


@jax.jit
def lam_gconv(X, A, W, bias):
    """X: (B, N, Fin), A: (N, N), W: (Fout, Fin) torch layout, bias: (Fout,)."""
    B, N, Fin = X.shape
    Fout = W.shape[0]
    Fp = _round_up(Fout, 128)
    cdt = X.dtype

    # --- Hoisted once (A is shared across batch): symmetric-normalized Laplacian.
    #     rsqrt/eps math kept in f32 regardless of compute dtype.
    col = jnp.sum(A.astype(jnp.float32), axis=0) + 1e-5          # matches torch.sum(A_hat, 1)
    d = col ** (-0.5)                                            # (N,)
    L = (d[:, None] * A.astype(jnp.float32) * d[None, :]).astype(cdt)

    # --- Lane-dense weights / bias: pad Fout to a multiple of 128 so the kernel's
    #     output stores are unmasked full-lane writes. Padding is sliced off below.
    Wt = jnp.zeros((Fin, Fp), cdt).at[:, :Fout].set(W.T.astype(cdt))
    b2 = jnp.zeros((1, Fp), jnp.float32).at[0, :Fout].set(bias.astype(jnp.float32))

    tb = _batch_tile(B, N, Fin, Fp, jnp.dtype(cdt).itemsize)
    aggregate_first = Fin <= Fout

    out = pl.pallas_call(
        functools.partial(lam_gconv_kernel, tb=tb, aggregate_first=aggregate_first),
        out_shape=jax.ShapeDtypeStruct((B, N, Fp), cdt),
        grid_spec=pltpu.PrefetchScalarGridSpec(
            num_scalar_prefetch=0,
            grid=(B // tb,),
            in_specs=[
                pl.BlockSpec((N, N), lambda b: (0, 0)),            # L   (shared)
                pl.BlockSpec((tb, N, Fin), lambda b: (b, 0, 0)),   # X tile
                pl.BlockSpec((Fin, Fp), lambda b: (0, 0)),         # W.T (shared)
                pl.BlockSpec((1, Fp), lambda b: (0, 0)),           # bias (shared)
            ],
            out_specs=pl.BlockSpec((tb, N, Fp), lambda b: (b, 0, 0)),
        ),
        # TODO(synk): on v7x, evaluate pltpu.CORE_PARALLEL on the batch-tile axis
        # (and a tighter 64 MiB VMEM budget / row-tiling of L for very large N).
        compiler_params=pltpu.CompilerParams(
            dimension_semantics=("parallel",)),
    )(L, X, Wt, b2)

    return out[:, :, :Fout]


def lam_gconv_ref(X, A, W, bias):
    """Pure-JAX reference mirroring the PyTorch forward."""
    batch = X.shape[0]
    A_hat = jnp.broadcast_to(A[None], (batch,) + A.shape)
    D_hat = (jnp.sum(A_hat, axis=1) + 1e-5) ** (-0.5)
    L = D_hat[:, :, None] * A_hat * D_hat[:, None, :]
    Y = jnp.einsum("bij,bjf->bif", L, X)
    Z = jnp.einsum("bif,of->bio", Y, W) + bias
    return jnp.maximum(Z, 0.0)


if __name__ == "__main__":
    batch, N, in_features, out_features = 2, 16, 8, 32

    key = jax.random.PRNGKey(0)
    k_a, k_x, k_w, k_b = jax.random.split(key, 4)

    # Non-negative adjacency (typical for graph conv); keeps the rsqrt well-defined.
    A = jax.random.uniform(k_a, (N, N), dtype=jnp.float32)
    X = jax.random.normal(k_x, (batch, N, in_features), dtype=jnp.float32)

    # Deterministic nn.Linear-style parameters (Kaiming-uniform-ish bound).
    bound = 1.0 / (in_features ** 0.5)
    W = jax.random.uniform(k_w, (out_features, in_features), dtype=jnp.float32,
                           minval=-bound, maxval=bound)
    bias = jax.random.uniform(k_b, (out_features,), dtype=jnp.float32,
                              minval=-bound, maxval=bound)

    out = lam_gconv(X, A, W, bias)
    out = jax.block_until_ready(out)

    ref = lam_gconv_ref(X, A, W, bias)
    assert out.shape == (batch, N, out_features)
    assert jnp.allclose(out, ref, atol=1e-5, rtol=1e-5), (
        f"max abs err {jnp.max(jnp.abs(out - ref))}")

    print("KERNEL_OK")
</pallas_src>

<mosaic_0001>
module attributes {stable_mosaic.version = 11 : i64} {
  func.func @lam_gconv_kernel(%arg0: i32, %arg1: memref<16x16xf32, #tpu.memory_space<vmem>>, %arg2: memref<2x16x8xf32, #tpu.memory_space<vmem>>, %arg3: memref<8x128xf32, #tpu.memory_space<vmem>>, %arg4: memref<1x128xf32, #tpu.memory_space<vmem>>, %arg5: memref<2x16x128xf32, #tpu.memory_space<vmem>>) attributes {dimension_semantics = [#tpu.dimension_semantics<parallel>], iteration_bounds = array<i64: 1>, scalar_prefetch = 0 : i64, scratch_operands = 0 : i64, tpu.core_type = #tpu.core_type<tc>, window_params = [{pipeline_mode = #tpu.pipeline_mode<synchronous>, transform_indices = @transform_0, window_bounds = array<i64: 16, 16>}, {transform_indices = @transform_1, window_bounds = array<i64: 2, 16, 8>}, {pipeline_mode = #tpu.pipeline_mode<synchronous>, transform_indices = @transform_2, window_bounds = array<i64: 8, 128>}, {pipeline_mode = #tpu.pipeline_mode<synchronous>, transform_indices = @transform_3, window_bounds = array<i64: 1, 128>}, {transform_indices = @transform_4, window_bounds = array<i64: 2, 16, 128>}]} {
    %c0 = arith.constant 0 : index
    %c0_0 = arith.constant 0 : index
    %0 = vector.load %arg1[%c0, %c0_0] : memref<16x16xf32, #tpu.memory_space<vmem>>, vector<16x16xf32>
    %c0_1 = arith.constant 0 : index
    %c0_2 = arith.constant 0 : index
    %1 = vector.load %arg3[%c0_1, %c0_2] : memref<8x128xf32, #tpu.memory_space<vmem>>, vector<8x128xf32>
    %c0_3 = arith.constant 0 : index
    %c0_4 = arith.constant 0 : index
    %2 = vector.load %arg4[%c0_3, %c0_4] : memref<1x128xf32, #tpu.memory_space<vmem>>, vector<1x128xf32>
    %3 = vector.shape_cast %2 : vector<1x128xf32> to vector<1x128xf32>
    %4 = vector.broadcast %3 : vector<1x128xf32> to vector<16x128xf32>
    %c0_5 = arith.constant 0 : index
    %c0_6 = arith.constant 0 : index
    %c0_7 = arith.constant 0 : index
    %5 = vector.load %arg2[%c0_5, %c0_6, %c0_7] : memref<2x16x8xf32, #tpu.memory_space<vmem>>, vector<1x16x8xf32>
    %6 = vector.shape_cast %5 : vector<1x16x8xf32> to vector<16x8xf32>
    %cst = arith.constant dense<0.000000e+00> : vector<16x8xf32>
    %7 = tpu.matmul %0, %6, %cst {dimension_numbers = #tpu.dot_dimension_numbers<[1], [0], [0], [1], [0, 0, 1, 1], [], []>} : vector<16x16xf32>, vector<16x8xf32>, vector<16x8xf32> -> vector<16x8xf32>
    %cst_8 = arith.constant dense<0.000000e+00> : vector<16x128xf32>
    %8 = tpu.matmul %7, %1, %cst_8 {dimension_numbers = #tpu.dot_dimension_numbers<[1], [0], [0], [1], [0, 0, 1, 1], [], []>} : vector<16x8xf32>, vector<8x128xf32>, vector<16x128xf32> -> vector<16x128xf32>
    %9 = arith.addf %8, %4 : vector<16x128xf32>
    %cst_9 = arith.constant 0.000000e+00 : f32
    %10 = vector.broadcast %cst_9 : f32 to vector<16x128xf32>
    %11 = arith.maximumf %9, %10 : vector<16x128xf32>
    %c0_10 = arith.constant 0 : index
    %c0_11 = arith.constant 0 : index
    %c0_12 = arith.constant 0 : index
    %12 = vector.load %arg5[%c0_10, %c0_11, %c0_12] : memref<2x16x128xf32, #tpu.memory_space<vmem>>, vector<1x16x128xf32>
    %13 = vector.shape_cast %12 : vector<1x16x128xf32> to vector<16x128xf32>
    %14 = vector.shape_cast %11 : vector<16x128xf32> to vector<1x16x128xf32>
    tpu.vector_store %arg5[%c0_10, %c0_11, %c0_12], %14 {strides = array<i32>} : memref<2x16x128xf32, #tpu.memory_space<vmem>>, vector<1x16x128xf32>,
    %c1 = arith.constant 1 : index
    %c0_13 = arith.constant 0 : index
    %c0_14 = arith.constant 0 : index
    %15 = vector.load %arg2[%c1, %c0_13, %c0_14] : memref<2x16x8xf32, #tpu.memory_space<vmem>>, vector<1x16x8xf32>
    %16 = vector.shape_cast %15 : vector<1x16x8xf32> to vector<16x8xf32>
    %cst_15 = arith.constant dense<0.000000e+00> : vector<16x8xf32>
    %17 = tpu.matmul %0, %16, %cst_15 {dimension_numbers = #tpu.dot_dimension_numbers<[1], [0], [0], [1], [0, 0, 1, 1], [], []>} : vector<16x16xf32>, vector<16x8xf32>, vector<16x8xf32> -> vector<16x8xf32>
    %cst_16 = arith.constant dense<0.000000e+00> : vector<16x128xf32>
    %18 = tpu.matmul %17, %1, %cst_16 {dimension_numbers = #tpu.dot_dimension_numbers<[1], [0], [0], [1], [0, 0, 1, 1], [], []>} : vector<16x8xf32>, vector<8x128xf32>, vector<16x128xf32> -> vector<16x128xf32>
    %19 = arith.addf %18, %4 : vector<16x128xf32>
    %cst_17 = arith.constant 0.000000e+00 : f32
    %20 = vector.broadcast %cst_17 : f32 to vector<16x128xf32>
    %21 = arith.maximumf %19, %20 : vector<16x128xf32>
    %c1_18 = arith.constant 1 : index
    %c0_19 = arith.constant 0 : index
    %c0_20 = arith.constant 0 : index
    %22 = vector.load %arg5[%c1_18, %c0_19, %c0_20] : memref<2x16x128xf32, #tpu.memory_space<vmem>>, vector<1x16x128xf32>
    %23 = vector.shape_cast %22 : vector<1x16x128xf32> to vector<16x128xf32>
    %24 = vector.shape_cast %21 : vector<16x128xf32> to vector<1x16x128xf32>
    tpu.vector_store %arg5[%c1_18, %c0_19, %c0_20], %24 {strides = array<i32>} : memref<2x16x128xf32, #tpu.memory_space<vmem>>, vector<1x16x128xf32>,
    return
  }
  func.func @transform_0(%arg0: i32) -> (i32, i32) {
    %c0_i32 = arith.constant 0 : i32
    %c0_i32_0 = arith.constant 0 : i32
    %c0_i32_1 = arith.constant 0 : i32
    return %c0_i32, %c0_i32_0 : i32, i32
  }
  func.func @transform_1(%arg0: i32) -> (i32, i32, i32) {
    %c0_i32 = arith.constant 0 : i32
    %c0_i32_0 = arith.constant 0 : i32
    %c0_i32_1 = arith.constant 0 : i32
    return %arg0, %c0_i32, %c0_i32_0 : i32, i32, i32
  }
  func.func @transform_2(%arg0: i32) -> (i32, i32) {
    %c0_i32 = arith.constant 0 : i32
    %c0_i32_0 = arith.constant 0 : i32
    %c0_i32_1 = arith.constant 0 : i32
    return %c0_i32, %c0_i32_0 : i32, i32
  }
  func.func @transform_3(%arg0: i32) -> (i32, i32) {
    %c0_i32 = arith.constant 0 : i32
    %c0_i32_0 = arith.constant 0 : i32
    %c0_i32_1 = arith.constant 0 : i32
    return %c0_i32, %c0_i32_0 : i32, i32
  }
  func.func @transform_4(%arg0: i32) -> (i32, i32, i32) {
    %c0_i32 = arith.constant 0 : i32
    %c0_i32_0 = arith.constant 0 : i32
    %c0_i32_1 = arith.constant 0 : i32
    return %arg0, %c0_i32, %c0_i32_0 : i32, i32, i32
  }
}

</mosaic_0001>

<bundles_post_ra>
// kernel: lam_gconv.1
= control target key start
LH: loop header
LB: loop body
LE: loop exit
PB: predicated region body
PF: predicated region fallthrough
CT: control target
= control target key end

     0   :  { %vm30_vm0 = vcmask 130048   ;;  %s534_s0 = inlined_call_operand.vmem [shape: f32[16,16], index: 0, kind: input, shape index: {}]   ;;  %s535_s1 = inlined_call_operand.vmem [shape: f32[2,16,8], index: 1, kind: input, shape index: {}]   ;;  %s536_s2 = inlined_call_operand.vmem [shape: f32[8,128], index: 2, kind: input, shape index: {}]   ;;  %s537_s3 = inlined_call_operand.vmem [shape: f32[1,128], index: 3, kind: input, shape index: {}]   ;;  %s538_s4 = inlined_call_operand.hbm [shape: f32[2,16,128], index: 4, kind: output, shape index: {}]  }
   0x1   :  { %v28_v0 = vld [vmem:[%s535_s1] sm:$0xff]  ;;  %v29_v1 = vld [vmem:[%s535_s1 + $0x8] sm:$0xff] }
   0x2   :  { %v18_v2 = vld [vmem:[%s534_s0] sm:$0xff]  ;;  %v427_v3 = vpack.c.bf16 %v29_v1, %v28_v0 }
   0x3   :  { %407 = vmatprep.mubr.msk.f32.mxu0 %vm30_vm0, %v18_v2 }
   0x4   :  { %9 = vsyncpa [#allocation3], 0  ;;  %428 = vmatprep.subr.bf16.mxu0 %v427_v3  ;;  %v19_v4 = vld [vmem:[%s534_s0 + $0x8] sm:$0xff]  ;;  %v20_v5 = vld [vmem:[%s536_s2] sm:$0xff]  ;;  %vm112_vm1 = vcmask 64512   ;;  %s462_s2 = smov [#allocation2]  }
   0x5   :  { %430 = vmatpush3.bf16.msra.mxu0 %v427_v3  ;;  %v383_v6 = vld [vmem:[%s535_s1 + $0x10] sm:$0xff]  ;;  %v384_v7 = vld [vmem:[%s535_s1 + $0x18] sm:$0xff]  ;;  %410 = vmatprep.subr.mxu1 %v20_v5  ;;  %v378_v11 = vld [vmem:[%s537_s3] ss:$0 sm:$0xff]  ;;  %s367_s29 = sshll.u32 %s462_s2, 4  ;;  %s368_s29 = int_to_ptr.vmem [resolvable:$true] %s367_s29 }
   0x6   :  { %v431_v8 = vpack.c.bf16 %v384_v7, %v383_v6  ;;  %422 = vmatprep.subr.mxu0 %v20_v5  ;;  %411 = vmatpush3.msra.mxu1 %v20_v5  ;;  %s438_s3 = scalar_lea.vmem %s368_s29, 512  ;;  %p443_p1 = scmp.lt.s32.totalorder %s368_s29, %s368_s29 }
   0x7   :  { %p439_p0 = scmp.ne.s32.totalorder %s368_s29, %s438_s3  ;;  %p444_p2 = scmp.lt.s32.totalorder %s438_s3, %s438_s3 }
   0x8   :  { %408 = vmatmul.mubr.msk.f32.vlgmr.msra.gmra.mrb[0].mxu0 %vm30_vm0, %v19_v4  ;;  %432 = vmatprep.subr.bf16.mxu1 %v431_v8 }
   0x9   :  { %423 = vmatpush3.msra.mxu0 %v20_v5  ;;  %p445_p3 = por %p444_p2, %p443_p1 }
   0xb   :  { %p446_p4 = pnand %p445_p3, %p439_p0 }
  0xdb   :  { %v409_v9 = vpop.f32.mrb[0].mxu0 }
  0xdc   :  { %v103_v10 = vpop.f32.mrb[1].mxu0 }
  0xdd   :  { %412 = vmatprep.mubr.msk.f32.mxu1 %vm112_vm1, %v103_v10 }
  0xde   :  { %413 = vmatmul.mubr.msk.f32.vlgmr.msra.gmra.mrb[0].mxu1 %vm112_vm1, %v409_v9 }
  0xdf   :  { %434 = vmatpush3.bf16.msra.mxu1 %v431_v8  ;;  %419 = vmatprep.mubr.msk.f32.mxu1 %vm30_vm0, %v18_v2 }
  0xe2   :  { %420 = vmatmul.mubr.msk.f32.vlgmr.msra.gmra.mrb[2].mxu1 %vm30_vm0, %v19_v4 }
 0x1b1   :  { %v414_v12 = vpop.f32.mrb[0].mxu1 }
 0x1b2   :  { %v191_v13 = vadd.f32 %v414_v12, %v378_v11  ;;  %v185_v14 = vpop.f32.mrb[1].mxu1 }
 0x1b3   :  { %v186_v15 = vadd.f32 %v378_v11, %v185_v14 }
 0x1b4   :  { %v195_v16 = vmax.f32 %v191_v13, 0.0 }
 0x1b5   :  { %v194_v17 = vmax.f32 %v186_v15, 0.0  ;;  %v421_v18 = vpop.f32.mrb[2].mxu1 }
 0x1b6   :  { %197 = vst [vmem:[#allocation2 + $0x8] sm:$0xff] %v195_v16  ;;  %v267_v19 = vpop.f32.mrb[3].mxu1 }
 0x1b7   :  { %196 = vst [vmem:[#allocation2] sm:$0xff] %v194_v17  ;;  %424 = vmatprep.mubr.msk.f32.mxu0 %vm112_vm1, %v267_v19 }
 0x1b8   :  { %425 = vmatmul.mubr.msk.f32.vlgmr.msra.gmra.mrb[2].mxu0 %vm112_vm1, %v421_v18 }
 0x28b   :  { %v426_v20 = vpop.f32.mrb[2].mxu0 }
 0x28c   :  { %v354_v21 = vadd.f32 %v426_v20, %v378_v11  ;;  %v348_v22 = vpop.f32.mrb[3].mxu0 }
 0x28d   :  { %v349_v23 = vadd.f32 %v378_v11, %v348_v22 }
 0x28e   :  { %v358_v24 = vmax.f32 %v354_v21, 0.0 }
 0x28f   :  { %v357_v25 = vmax.f32 %v349_v23, 0.0 }
 0x290   :  { %361 = vst [vmem:[#allocation2 + $0x18] sm:$0xff] %v358_v24 }
 0x291   :  { %360 = vst [vmem:[#allocation2 + $0x10] sm:$0xff] %v357_v25 }
 0x292   :  { %449 = shalt.err (!%p446_p4)
}
 0x293   :  { %s450_s6 = scalar_lea.hbm %s538_s4, 512 }
 0x294   :  { %p451_p5 = scmp.ne.s32.totalorder %s538_s4, %s450_s6  ;;  %p454_p6 = scmp.lt.u32.totalorder %s450_s6, %s538_s4 }
 0x296   :  { %p456_p7 = pnand %p454_p6, %p451_p5 }
 0x298   :  { %459 = shalt.err (!%p456_p7)
}
 0x299   :  { %s463_s11 = smov 128   ;;  %s464_s12 = smov 8  }
 0x29a   :  { %373 = dma.vmem_to_hbm [thread:$0]  %s368_s29, 512, %s538_s4, [#allocation3], %s463_s11, %s463_s11, %s464_s12  }
 0x29b   :  { %460 = dma.done.wait [#allocation3], 512  }
 0x29c   :  { %461 = vsyncadd [#allocation3], 4294966784 }
 0x29d   :  { %377 = vsyncpa [#allocation3], 1 }

</bundles_post_ra>
